<compile_context>
chip_gen: v5e
topology: v5e:2x2
jax: 0.10.0
libtpu: 0.0.40
codegen_flags: <defaults>
</compile_context>

<pallas_src>
import jax
import jax.numpy as jnp
from jax.experimental import pallas as pl
from jax.experimental.pallas import tpu as pltpu


HIDDEN_PAD = 128  # pad the hidden dim to a full lane width


def _confidence_kernel(state_ref, action_ref, w1s_ref, w1a_ref, b1_ref,
                       w2_ref, b2_ref, w3_ref, b3_ref, o_ref):
    """One batch tile: fused split-matmul (concat-free) -> relu -> matmul -> relu
    -> lane-reduce -> sigmoid."""
    # fc1: torch.cat([state, action]) @ W1 == state @ W1[:Ds] + action @ W1[Ds:]
    h1 = jnp.dot(state_ref[...], w1s_ref[...], preferred_element_type=jnp.float32)
    h1 = h1 + jnp.dot(action_ref[...], w1a_ref[...], preferred_element_type=jnp.float32)
    h1 = jnp.maximum(h1 + b1_ref[...], 0.0)            # f32 epilogue (v5e VPU has no bf16)

    # fc2: bf16 MXU inputs, f32 accumulation.
    h2 = jnp.dot(h1.astype(jnp.bfloat16), w2_ref[...],
                 preferred_element_type=jnp.float32)
    h2 = jnp.maximum(h2 + b2_ref[...], 0.0)

    # fc3 (H -> 1): an N=1 MXU matmul wastes a whole MXU pass for one lane; do it as a
    # VPU multiply + XLU lane reduction instead.  Padded lanes of w3 are zero.
    logit = jnp.sum(h2 * w3_ref[...], axis=-1, keepdims=True) + b3_ref[0]

    # sigmoid: exp and the approximate reciprocal both live in the otherwise-idle EUP slot.
    # Output block stays (TILE_B, 1): the output stream is <7% of HBM traffic here, so the
    # masked-store cost is negligible and we avoid an in-kernel sublane->lane relayout.
    o_ref[...] = pl.reciprocal(1.0 + jnp.exp(-logit), approx=True)


def init_params(key, state_dim, action_dim, hidden_dim=64):
    """PyTorch nn.Linear default init: U(-1/sqrt(fan_in), +1/sqrt(fan_in))."""
    in_dim = state_dim + action_dim
    ks = jax.random.split(key, 6)

    def linear(kw, kb, fan_in, fan_out):
        bound = 1.0 / jnp.sqrt(fan_in)
        w = jax.random.uniform(kw, (fan_in, fan_out), jnp.float32, -bound, bound)
        b = jax.random.uniform(kb, (fan_out,), jnp.float32, -bound, bound)
        return w, b

    w1, b1 = linear(ks[0], ks[1], in_dim, hidden_dim)
    w2, b2 = linear(ks[2], ks[3], hidden_dim, hidden_dim)
    w3, b3 = linear(ks[4], ks[5], hidden_dim, 1)
    return (w1, b1, w2, b2, w3, b3)


def prepare_params(params, state_dim, hidden_pad=HIDDEN_PAD):
    """One-time prep: split W1 (kills the concat), zero-pad hidden 64->128, cast MXU
    weights to bf16.  Zero-padded columns/rows are inert under ReLU and the zero-padded
    w3 row, so the math is unchanged."""
    w1, b1, w2, b2, w3, b3 = params
    in_dim, hidden = w1.shape
    hp = max(hidden_pad, hidden)

    w1p = jnp.zeros((in_dim, hp), jnp.float32).at[:, :hidden].set(w1)
    w2p = jnp.zeros((hp, hp), jnp.float32).at[:hidden, :hidden].set(w2)
    b1p = jnp.zeros((1, hp), jnp.float32).at[0, :hidden].set(b1)
    b2p = jnp.zeros((1, hp), jnp.float32).at[0, :hidden].set(b2)
    w3p = jnp.zeros((1, hp), jnp.float32).at[0, :hidden].set(w3[:, 0])

    return dict(
        w1s=w1p[:state_dim].astype(jnp.bfloat16),   # (Ds, Hp) bf16
        w1a=w1p[state_dim:].astype(jnp.bfloat16),   # (Da, Hp) bf16
        b1=b1p,                                     # (1, Hp)  f32
        w2=w2p.astype(jnp.bfloat16),                # (Hp, Hp) bf16
        b2=b2p,                                     # (1, Hp)  f32
        w3=w3p,                                     # (1, Hp)  f32 (VPU epilogue)
        b3=jnp.reshape(b3, (1,)).astype(jnp.float32),  # SMEM scalar
    )


def confidence_forward(state, action, prepped, *, tile_b=512):
    """state: (B, state_dim), action: (B, action_dim) -> (B, 1) confidence."""
    B, ds = state.shape
    _, da = action.shape
    hp = prepped["w2"].shape[0]

    # bf16 activations for the MXU (in production the caller would hand these in bf16).
    state = state.astype(jnp.bfloat16)
    action = action.astype(jnp.bfloat16)

    # One batch tile per grid step.  tile_b ~512 keeps per-step overhead amortized while
    # double-buffered tiles stay tiny (well under scoped-VMEM limits on v5e/v6e/v7x).
    tb = B if B <= tile_b else tile_b
    grid = (pl.cdiv(B, tb),)

    # Weights / biases: constant block index -> fetched once, VMEM-resident across grid.
    const = lambda shape: pl.BlockSpec(shape, lambda i: (0, 0))

    return pl.pallas_call(
        _confidence_kernel,
        out_shape=jax.ShapeDtypeStruct((B, 1), jnp.float32),
        grid=grid,
        in_specs=[
            pl.BlockSpec((tb, ds), lambda i: (i, 0)),            # state tile
            pl.BlockSpec((tb, da), lambda i: (i, 0)),            # action tile
            const((ds, hp)),                                     # W1[:state_dim]
            const((da, hp)),                                     # W1[state_dim:]
            const((1, hp)),                                      # b1
            const((hp, hp)),                                     # W2
            const((1, hp)),                                      # b2
            const((1, hp)),                                      # w3 row
            pl.BlockSpec(memory_space=pltpu.MemorySpace.SMEM),   # b3 scalar
        ],
        out_specs=pl.BlockSpec((tb, 1), lambda i: (i, 0)),
        compiler_params=pltpu.CompilerParams(
            # Batch axis is embarrassingly parallel -> second TensorCore on v7x,
            # harmless no-op on v5e/v6e.
            dimension_semantics=("parallel",),
        ),
    )(state, action, prepped["w1s"], prepped["w1a"], prepped["b1"],
      prepped["w2"], prepped["b2"], prepped["w3"], prepped["b3"])


if __name__ == "__main__":
    key = jax.random.PRNGKey(0)
    state_dim, action_dim, hidden_dim = 12, 4, 64

    kp = jax.random.fold_in(key, 0)
    params = init_params(kp, state_dim, action_dim, hidden_dim)
    prepped = prepare_params(params, state_dim)

    def reference(state, action, params):
        w1, b1, w2, b2, w3, b3 = params
        x = jnp.concatenate([state, action], axis=-1)
        h1 = jax.nn.relu(x @ w1 + b1)
        h2 = jax.nn.relu(h1 @ w2 + b2)
        return jax.nn.sigmoid(h2 @ w3 + b3)

    # Small batch (single grid step) and a multi-tile batch (exercises pipelining).
    for batch in (8, 1536):
        ksb, kab = jax.random.split(jax.random.fold_in(key, batch))
        state = jax.random.normal(ksb, (batch, state_dim), jnp.float32)
        action = jax.random.normal(kab, (batch, action_dim), jnp.float32)

        out = confidence_forward(state, action, prepped)
        jax.block_until_ready(out)

        ref = reference(state, action, params)
        assert out.shape == (batch, 1)
        err = float(jnp.max(jnp.abs(out - ref)))
        # bf16 MXU inputs vs f32 reference -> loose-but-meaningful tolerance.
        assert err < 2e-2, f"mismatch vs reference at batch={batch}: max abs err {err}"

    print("KERNEL_OK")
</pallas_src>

<mosaic_0001>
module attributes {stable_mosaic.version = 11 : i64} {
  func.func @_confidence_kernel(%arg0: i32, %arg1: memref<8x12xbf16, #tpu.memory_space<vmem>>, %arg2: memref<8x4xbf16, #tpu.memory_space<vmem>>, %arg3: memref<12x128xbf16, #tpu.memory_space<vmem>>, %arg4: memref<4x128xbf16, #tpu.memory_space<vmem>>, %arg5: memref<1x128xf32, #tpu.memory_space<vmem>>, %arg6: memref<128x128xbf16, #tpu.memory_space<vmem>>, %arg7: memref<1x128xf32, #tpu.memory_space<vmem>>, %arg8: memref<1x128xf32, #tpu.memory_space<vmem>>, %arg9: memref<1xf32, #tpu.memory_space<smem>>, %arg10: memref<8x1xf32, #tpu.memory_space<vmem>>) attributes {dimension_semantics = [#tpu.dimension_semantics<parallel>], iteration_bounds = array<i64: 1>, scalar_prefetch = 0 : i64, scratch_operands = 0 : i64, tpu.core_type = #tpu.core_type<tc>, window_params = [{transform_indices = @transform_0, window_bounds = array<i64: 8, 12>}, {transform_indices = @transform_1, window_bounds = array<i64: 8, 4>}, {pipeline_mode = #tpu.pipeline_mode<synchronous>, transform_indices = @transform_2, window_bounds = array<i64: 12, 128>}, {pipeline_mode = #tpu.pipeline_mode<synchronous>, transform_indices = @transform_3, window_bounds = array<i64: 4, 128>}, {pipeline_mode = #tpu.pipeline_mode<synchronous>, transform_indices = @transform_4, window_bounds = array<i64: 1, 128>}, {pipeline_mode = #tpu.pipeline_mode<synchronous>, transform_indices = @transform_5, window_bounds = array<i64: 128, 128>}, {pipeline_mode = #tpu.pipeline_mode<synchronous>, transform_indices = @transform_6, window_bounds = array<i64: 1, 128>}, {pipeline_mode = #tpu.pipeline_mode<synchronous>, transform_indices = @transform_7, window_bounds = array<i64: 1, 128>}, {transform_indices = @transform_8, window_bounds = array<i64: 1>}, {transform_indices = @transform_9, window_bounds = array<i64: 8, 1>}]} {
    %c0 = arith.constant 0 : index
    %c0_0 = arith.constant 0 : index
    %0 = vector.load %arg1[%c0, %c0_0] : memref<8x12xbf16, #tpu.memory_space<vmem>>, vector<8x12xbf16>
    %c0_1 = arith.constant 0 : index
    %c0_2 = arith.constant 0 : index
    %1 = vector.load %arg3[%c0_1, %c0_2] : memref<12x128xbf16, #tpu.memory_space<vmem>>, vector<12x128xbf16>
    %cst = arith.constant dense<0.000000e+00> : vector<8x128xf32>
    %2 = tpu.matmul %0, %1, %cst {dimension_numbers = #tpu.dot_dimension_numbers<[1], [0], [0], [1], [0, 0, 1, 1], [], []>} : vector<8x12xbf16>, vector<12x128xbf16>, vector<8x128xf32> -> vector<8x128xf32>
    %c0_3 = arith.constant 0 : index
    %c0_4 = arith.constant 0 : index
    %3 = vector.load %arg2[%c0_3, %c0_4] : memref<8x4xbf16, #tpu.memory_space<vmem>>, vector<8x4xbf16>
    %c0_5 = arith.constant 0 : index
    %c0_6 = arith.constant 0 : index
    %4 = vector.load %arg4[%c0_5, %c0_6] : memref<4x128xbf16, #tpu.memory_space<vmem>>, vector<4x128xbf16>
    %cst_7 = arith.constant dense<0.000000e+00> : vector<8x128xf32>
    %5 = tpu.matmul %3, %4, %cst_7 {dimension_numbers = #tpu.dot_dimension_numbers<[1], [0], [0], [1], [0, 0, 1, 1], [], []>} : vector<8x4xbf16>, vector<4x128xbf16>, vector<8x128xf32> -> vector<8x128xf32>
    %6 = arith.addf %2, %5 : vector<8x128xf32>
    %c0_8 = arith.constant 0 : index
    %c0_9 = arith.constant 0 : index
    %7 = vector.load %arg5[%c0_8, %c0_9] : memref<1x128xf32, #tpu.memory_space<vmem>>, vector<1x128xf32>
    %8 = vector.broadcast %7 : vector<1x128xf32> to vector<8x128xf32>
    %9 = arith.addf %6, %8 : vector<8x128xf32>
    %cst_10 = arith.constant 0.000000e+00 : f32
    %10 = vector.broadcast %cst_10 : f32 to vector<8x128xf32>
    %11 = arith.maximumf %9, %10 : vector<8x128xf32>
    %12 = arith.truncf %11 : vector<8x128xf32> to vector<8x128xbf16>
    %c0_11 = arith.constant 0 : index
    %c0_12 = arith.constant 0 : index
    %13 = vector.load %arg6[%c0_11, %c0_12] : memref<128x128xbf16, #tpu.memory_space<vmem>>, vector<128x128xbf16>
    %cst_13 = arith.constant dense<0.000000e+00> : vector<8x128xf32>
    %14 = tpu.matmul %12, %13, %cst_13 {dimension_numbers = #tpu.dot_dimension_numbers<[1], [0], [0], [1], [0, 0, 1, 1], [], []>} : vector<8x128xbf16>, vector<128x128xbf16>, vector<8x128xf32> -> vector<8x128xf32>
    %c0_14 = arith.constant 0 : index
    %c0_15 = arith.constant 0 : index
    %15 = vector.load %arg7[%c0_14, %c0_15] : memref<1x128xf32, #tpu.memory_space<vmem>>, vector<1x128xf32>
    %16 = vector.broadcast %15 : vector<1x128xf32> to vector<8x128xf32>
    %17 = arith.addf %14, %16 : vector<8x128xf32>
    %cst_16 = arith.constant 0.000000e+00 : f32
    %18 = vector.broadcast %cst_16 : f32 to vector<8x128xf32>
    %19 = arith.maximumf %17, %18 : vector<8x128xf32>
    %c0_17 = arith.constant 0 : index
    %c0_18 = arith.constant 0 : index
    %20 = vector.load %arg8[%c0_17, %c0_18] : memref<1x128xf32, #tpu.memory_space<vmem>>, vector<1x128xf32>
    %21 = vector.broadcast %20 : vector<1x128xf32> to vector<8x128xf32>
    %22 = arith.mulf %19, %21 : vector<8x128xf32>
    %cst_19 = arith.constant dense<0.000000e+00> : vector<8xf32>
    %23 = vector.multi_reduction <add>, %22, %cst_19 [1] : vector<8x128xf32> to vector<8xf32>
    %24 = vector.shape_cast %23 : vector<8xf32> to vector<8x1xf32>
    %c0_20 = arith.constant 0 : index
    %25 = memref.load %arg9[%c0_20] : memref<1xf32, #tpu.memory_space<smem>>
    %26 = vector.broadcast %25 : f32 to vector<8x1xf32>
    %27 = arith.addf %24, %26 : vector<8x1xf32>
    %cst_21 = arith.constant 0.000000e+00 : f32
    %28 = vector.broadcast %cst_21 : f32 to vector<8x1xf32>
    %29 = arith.subf %28, %27 : vector<8x1xf32>
    %30 = math.exp %29 : vector<8x1xf32>
    %cst_22 = arith.constant 1.000000e+00 : f32
    %31 = vector.broadcast %cst_22 : f32 to vector<8x1xf32>
    %32 = arith.addf %31, %30 : vector<8x1xf32>
    %33 = tpu.reciprocal %32 {approx = true} : vector<8x1xf32> -> vector<8x1xf32>
    %c0_23 = arith.constant 0 : index
    %c0_24 = arith.constant 0 : index
    %34 = vector.load %arg10[%c0_23, %c0_24] : memref<8x1xf32, #tpu.memory_space<vmem>>, vector<8x1xf32>
    tpu.vector_store %arg10[%c0_23, %c0_24], %33 {strides = array<i32>} : memref<8x1xf32, #tpu.memory_space<vmem>>, vector<8x1xf32>,
    return
  }
  func.func @transform_0(%arg0: i32) -> (i32, i32) {
    %c0_i32 = arith.constant 0 : i32
    %c0_i32_0 = arith.constant 0 : i32
    return %arg0, %c0_i32 : i32, i32
  }
  func.func @transform_1(%arg0: i32) -> (i32, i32) {
    %c0_i32 = arith.constant 0 : i32
    %c0_i32_0 = arith.constant 0 : i32
    return %arg0, %c0_i32 : i32, i32
  }
  func.func @transform_2(%arg0: i32) -> (i32, i32) {
    %c0_i32 = arith.constant 0 : i32
    %c0_i32_0 = arith.constant 0 : i32
    %c0_i32_1 = arith.constant 0 : i32
    return %c0_i32, %c0_i32_0 : i32, i32
  }
  func.func @transform_3(%arg0: i32) -> (i32, i32) {
    %c0_i32 = arith.constant 0 : i32
    %c0_i32_0 = arith.constant 0 : i32
    %c0_i32_1 = arith.constant 0 : i32
    return %c0_i32, %c0_i32_0 : i32, i32
  }
  func.func @transform_4(%arg0: i32) -> (i32, i32) {
    %c0_i32 = arith.constant 0 : i32
    %c0_i32_0 = arith.constant 0 : i32
    %c0_i32_1 = arith.constant 0 : i32
    return %c0_i32, %c0_i32_0 : i32, i32
  }
  func.func @transform_5(%arg0: i32) -> (i32, i32) {
    %c0_i32 = arith.constant 0 : i32
    %c0_i32_0 = arith.constant 0 : i32
    %c0_i32_1 = arith.constant 0 : i32
    return %c0_i32, %c0_i32_0 : i32, i32
  }
  func.func @transform_6(%arg0: i32) -> (i32, i32) {
    %c0_i32 = arith.constant 0 : i32
    %c0_i32_0 = arith.constant 0 : i32
    %c0_i32_1 = arith.constant 0 : i32
    return %c0_i32, %c0_i32_0 : i32, i32
  }
  func.func @transform_7(%arg0: i32) -> (i32, i32) {
    %c0_i32 = arith.constant 0 : i32
    %c0_i32_0 = arith.constant 0 : i32
    %c0_i32_1 = arith.constant 0 : i32
    return %c0_i32, %c0_i32_0 : i32, i32
  }
  func.func @transform_8(%arg0: i32) -> i32 {
    %c0_i32 = arith.constant 0 : i32
    %c0_i32_0 = arith.constant 0 : i32
    return %c0_i32 : i32
  }
  func.func @transform_9(%arg0: i32) -> (i32, i32) {
    %c0_i32 = arith.constant 0 : i32
    %c0_i32_0 = arith.constant 0 : i32
    return %arg0, %c0_i32 : i32, i32
  }
}

</mosaic_0001>

<bundles_post_ra>
// kernel: tpu_custom_call.1
= control target key start
LH: loop header
LB: loop body
LE: loop exit
PB: predicated region body
PF: predicated region fallthrough
CT: control target
= control target key end

     0   :  { %15 = vsyncpa [#allocation4], 0  ;;  %s424_s0 = inlined_call_operand.vmem [shape: bf16[8,12], index: 0, kind: input, shape index: {}]   ;;  %s425_s1 = inlined_call_operand.vmem [shape: bf16[8,4], index: 1, kind: input, shape index: {}]   ;;  %s426_s2 = inlined_call_operand.hbm [shape: bf16[12,128], index: 2, kind: input, shape index: {}]   ;;  %s427_s3 = inlined_call_operand.vmem [shape: bf16[4,128], index: 3, kind: input, shape index: {}]   ;;  %s428_s4 = inlined_call_operand.vmem [shape: f32[1,128], index: 4, kind: input, shape index: {}]   ;;  %s429_s5 = inlined_call_operand.hbm [shape: bf16[128,128], index: 5, kind: input, shape index: {}]   ;;  %s430_s6 = inlined_call_operand.vmem [shape: f32[1,128], index: 6, kind: input, shape index: {}]   ;;  %s431_s7 = inlined_call_operand.vmem [shape: f32[1,128], index: 7, kind: input, shape index: {}]   ;;  %s432_s8 = inlined_call_operand.<no memory space> [shape: f32[1], index: 8, kind: input, shape index: {}]   ;;  %s433_s9 = inlined_call_operand.vmem [shape: f32[8,1], index: 9, kind: output, shape index: {}]  }
   0x1   :  { %s25_s11 = sshll.u32 %s426_s2, 4  ;;  %s26_s11 = int_to_ptr.hbm [resolvable:$true] %s25_s11 }
   0x2   :  { %16 = vsyncpa [#allocation6], 0  ;;  %s340_s12 = smov [#allocation3]   ;;  %s42_s16 = sshll.u32 %s429_s5, 4  ;;  %s43_s16 = int_to_ptr.hbm [resolvable:$true] %s42_s16 }
   0x3   :  { %s27_s13 = sshll.u32 %s340_s12, 4  ;;  %s341_s17 = smov 64   ;;  %s28_s13 = int_to_ptr.vmem [resolvable:$true] %s27_s13 }
   0x4   :  { %s342_s18 = smov 4   ;;  %s343_s19 = smov [#allocation5]  }
   0x5   :  { %33 = dma.hbm_to_vmem [thread:$0]  %s26_s11, 128, %s28_s13, [#allocation4], %s341_s17, %s341_s17, %s342_s18  }
   0x6   :  { %s44_s20 = sshll.u32 %s343_s19, 4  ;;  %s45_s20 = int_to_ptr.vmem [resolvable:$true] %s44_s20 }
   0x7   :  { %50 = dma.hbm_to_vmem [thread:$0]  %s43_s16, 1024, %s45_s20, [#allocation6], %s341_s17, %s341_s17, %s342_s18  }
   0x8   :  { %336 = dma.done.wait [#allocation4], 128  }
   0x9   :  { %337 = vsyncadd [#allocation4], 4294967168 }
   0xa   :  { %338 = dma.done.wait [#allocation6], 1024  }
   0xb   :  { %339 = vsyncadd [#allocation6], 4294966272  ;;  %vm75_vm0 = vcmask 1041408   ;;  %vm101_vm1 = vcmask 1045504   ;;  %v70_v0 = vld [vmem:[%s427_s3] sm:$0x3]  ;;  %v215_v32 = vstv %s432_s8 }
   0xc   :  { %v233_v1 = vld [vmem:[#allocation3] sm:$0xf]  ;;  %v268_v2 = vld [vmem:[#allocation3] sm:$0x30]  ;;  %v77_v3 = vsel %vm75_vm0, %v70_v0, 0  ;;  %vm71_vm2 = vcmask 31744  }
   0xd   :  { %v234_v4 = vor.u32 %v268_v2, %v233_v1  ;;  %v276_v5 = vld [vmem:[#allocation5 + $0x38] sm:$0xff]  ;;  %86 = vmatpush.bf16.msra.mxu0 %v77_v3  ;;  %v275_v8 = vld [vmem:[#allocation5 + $0x30] sm:$0xff]  ;;  %vm97_vm3 = vcmask 97280   ;;  %v274_v10 = vld [vmem:[#allocation5 + $0x28] sm:$0xff]  ;;  %vm222_vm4 = vcmask 7168  }
   0xe   :  { %v69_v6 = vld [vmem:[%s425_s1] sm:$0xf]  ;;  %193 = vmatpush.bf16.msra.mxu2 %v276_v5  ;;  %v273_v11 = vld [vmem:[#allocation5 + $0x20] sm:$0xff]  ;;  %v271_v13 = vld [vmem:[#allocation5 + $0x10] sm:$0xff] }
   0xf   :  { %v103_v7 = vsel %vm101_vm1, %v234_v4, 0  ;;  %v66_v9 = vld [vmem:[%s424_s0] sm:$0xf]  ;;  %v270_v14 = vld [vmem:[#allocation5 + $0x8] sm:$0xff]  ;;  %v269_v15 = vld [vmem:[#allocation5] sm:$0xff] }
  0x10   :  { %112 = vmatpush.bf16.msra.mxu1 %v103_v7  ;;  %230 = vmatmul.msk.bf16.vlgmr.msra.gmra.mxu0 %vm71_vm2, %v69_v6  ;;  %v272_v12 = vld [vmem:[#allocation5 + $0x18] sm:$0xff] }
  0x11   :  { %v281_v17 = vld [vmem:[%s428_s4] ss:$0 sm:$0xff] }
  0x12   :  { %194 = vmatpush.bf16.msra.mxu2 %v275_v8  ;;  %v282_v25 = vld [vmem:[%s430_s6] ss:$0 sm:$0xff] }
  0x13   :  { %235 = vmatmul.msk.bf16.vlgmr.msra.gmra.mxu1 %vm97_vm3, %v66_v9  ;;  %v283_v28 = vld [vmem:[%s431_s7] ss:$0 sm:$0xff] }
  0x16   :  { %195 = vmatpush.bf16.msra.mxu2 %v274_v10 }
  0x1a   :  { %196 = vmatpush.bf16.msra.mxu2 %v273_v11 }
  0x1e   :  { %197 = vmatpush.bf16.msra.mxu2 %v272_v12 }
  0x22   :  { %198 = vmatpush.bf16.msra.mxu2 %v271_v13 }
  0x26   :  { %199 = vmatpush.bf16.msra.mxu2 %v270_v14 }
  0x2a   :  { %200 = vmatpush.bf16.msra.mxu2 %v269_v15 }
  0x8d   :  { %v88_v16 = vpop.f32.mrf.mxu0 }
  0x90   :  { %v114_v18 = vpop.f32.mrf.mxu1 }
  0x91   :  { %v115_v19 = vadd.f32 %v114_v18, %v88_v16 }
  0x93   :  { %v122_v20 = vadd.f32 %v281_v17, %v115_v19 }
  0x95   :  { %v123_v21 = vmax.f32 %v122_v20, 0.0  ;;  %v90_v22 = vpop.f32.mrf.mxu0 }
  0x97   :  { %v124_v23 = vpack.c.bf16 %v123_v21, %v123_v21 }
  0x98   :  { %v116_v24 = vpop.f32.mrf.mxu1 }
  0x99   :  { %201 = vmatmul.bf16.vlgmr.msra.gmra.mxu2 %v124_v23 }
 0x11c   :  { %v202_v26 = vpop.f32.mrf.mxu2 }
 0x11d   :  { %v203_v27 = vadd.f32 %v282_v25, %v202_v26 }
 0x11f   :  { %v206_v29 = vmax.f32 %v203_v27, 0.0 }
 0x121   :  { %v211_v30 = vmul.f32 %v283_v28, %v206_v29 }
 0x123   :  { %212 = vadd.xlane.f32.xlu0 %v211_v30 }
 0x124   :  { %v204_v31 = vpop.f32.mrf.mxu2 }
 0x196   :  { %v213_v33 = vpop.xlane.xlu0 %212 }
 0x197   :  { %v216_v34 = vadd.f32 %v215_v32, %v213_v33 }
 0x199   :  { %v217_v35 = vsub.f32 0.0, %v216_v34 }
 0x19b   :  { %v218_v36 = vmul.f32 1.442695, %v217_v35 }
 0x19d   :  { %284 = vpow2.f32 %v218_v36 }
 0x1a3   :  { %v285_v37 = vpop.eup %284 }
 0x1a4   :  { %v220_v38 = vadd.f32 1.0, %v285_v37 }
 0x1a6   :  { %286 = vrcp.f32 %v220_v38 }
 0x1ac   :  { %v287_v39 = vpop.eup %286 }
 0x1ad   :  { %223 = vst.msk [vmem:[%s433_s9] sm:$0xff] %vm222_vm4, %v287_v39 }
 0x1ae   :  { %228 = vsyncpa [#allocation4], 1 }
 0x1af   :  { %229 = vsyncpa [#allocation6], 1 }

</bundles_post_ra>
